<compile_context>
chip_gen: v5e
topology: v5e:2x2
jax: 0.10.0
libtpu: 0.0.40
codegen_flags: <defaults>
</compile_context>

<pallas_src>
import jax
import jax.numpy as jnp
from jax.experimental import pallas as pl
from jax.experimental.pallas import tpu as pltpu

INPUT_SIZE = 784
HIDDEN = (128, 256, 128)
TM_MAX = 1024                  # upper bound on the batch tile (multiple of 16)


def _round_up(n, m):
    return -(-n // m) * m


def _choose_batch_tile(batch, tm_max=TM_MAX):
    """Pick the batch tile.

    Goals: big tiles (amortize ~0.35us/step overhead, M>=256 for the 256-wide
    v6e/v7x MXU), >=2 grid steps for v7x's two TensorCores when the batch is
    large, and near-even tiles so batch padding stays small.
    """
    b16 = _round_up(max(batch, 1), 16)           # 16: bf16 sublane packing
    if b16 <= min(tm_max, 512):
        return b16                               # single tile
    n_tiles = max(2, pl.cdiv(b16, tm_max))       # >=2 steps; even split bounds padding
    return _round_up(pl.cdiv(b16, n_tiles), 16)


def _mlp_kernel(x_ref, w1_ref, b1_ref, w2_ref, b2_ref, w3_ref, b3_ref, o_ref):
    # layer1 + ReLU (dropout = identity at inference); bf16 cast done in-kernel
    # so HBM only ever carries one f32 copy of x.
    x = x_ref[...].astype(jnp.bfloat16)
    h = jnp.dot(x, w1_ref[...], preferred_element_type=jnp.float32)
    h = jnp.maximum(h + b1_ref[...], 0.0)
    # layer2 + ReLU
    h = jnp.dot(h.astype(jnp.bfloat16), w2_ref[...],
                preferred_element_type=jnp.float32)
    h = jnp.maximum(h + b2_ref[...], 0.0)
    # layer3 + ReLU
    h = jnp.dot(h.astype(jnp.bfloat16), w3_ref[...],
                preferred_element_type=jnp.float32)
    h = jnp.maximum(h + b3_ref[...], 0.0)
    o_ref[...] = h.astype(o_ref.dtype)


def dnn_mnist28_forward(x, params, tm_max=TM_MAX, out_dtype=jnp.bfloat16):
    """x: (B, 784) float32.  params: bf16 weights (in, out), f32 biases (1, out)."""
    w1, b1 = params["w1"], params["b1"]
    w2, b2 = params["w2"], params["b2"]
    w3, b3 = params["w3"], params["b3"]
    B, d_in = x.shape
    out_dim = w3.shape[1]

    tile = _choose_batch_tile(B, tm_max)
    b_pad = _round_up(B, tile)
    if b_pad != B:
        # Only a small ragged remainder (tiles are split near-evenly above).
        x = jnp.pad(x, ((0, b_pad - B), (0, 0)))
    grid = (b_pad // tile,)

    def resident(arr):
        # Constant index_map -> DMA'd once, stays resident across grid steps.
        nd = arr.ndim
        return pl.BlockSpec(arr.shape, lambda i: (0,) * nd)

    flops = 2 * b_pad * (d_in * w1.shape[1]
                         + w2.shape[0] * w2.shape[1]
                         + w3.shape[0] * w3.shape[1])
    bytes_accessed = (x.size * x.dtype.itemsize
                      + (w1.size + w2.size + w3.size) * 2
                      + (b1.size + b2.size + b3.size) * 4
                      + b_pad * out_dim * jnp.dtype(out_dtype).itemsize)

    out = pl.pallas_call(
        _mlp_kernel,
        out_shape=jax.ShapeDtypeStruct((b_pad, out_dim), out_dtype),
        grid=grid,
        in_specs=[
            pl.BlockSpec((tile, d_in), lambda i: (i, 0)),   # x tile (f32 in HBM)
            resident(w1), resident(b1),
            resident(w2), resident(b2),
            resident(w3), resident(b3),
        ],
        out_specs=pl.BlockSpec((tile, out_dim), lambda i: (i, 0)),
        compiler_params=pltpu.CompilerParams(
            dimension_semantics=("parallel",),
            vmem_limit_bytes=(16 << 20) if tile <= 512 else (32 << 20),
        ),
        cost_estimate=pl.CostEstimate(
            flops=flops, bytes_accessed=bytes_accessed, transcendentals=0),
    )(x, w1, b1, w2, b2, w3, b3)

    return out if b_pad == B else out[:B]


def init_params(key, input_size=INPUT_SIZE, hidden_sizes=HIDDEN):
    """nn.Linear-style init U(-1/sqrt(fan_in), 1/sqrt(fan_in)).

    Weights stored (in, out) in bf16 (MXU-native); biases (1, out) f32.
    The unused `self.output` Linear of the PyTorch module is omitted since
    forward() never applies it.
    """
    params = {}
    dims = [input_size] + list(hidden_sizes)
    for i in range(3):
        fan_in, fan_out = dims[i], dims[i + 1]
        key, kw, kb = jax.random.split(key, 3)
        bound = 1.0 / jnp.sqrt(jnp.float32(fan_in))
        # PyTorch stores (out, in); transpose to (in, out) for the kernel.
        w = jax.random.uniform(kw, (fan_out, fan_in), jnp.float32, -bound, bound).T
        b = jax.random.uniform(kb, (1, fan_out), jnp.float32, -bound, bound)
        params[f"w{i + 1}"] = w.astype(jnp.bfloat16)
        params[f"b{i + 1}"] = b
    return params


def reference_forward(x, params):
    """Pure-JAX reference mirroring the kernel's bf16-input / f32-acc path.

    Note: weights are bf16 by design (model dtype), so this validates the
    kernel mechanics, not bf16-vs-f32 weight quantization error.
    """
    h = x
    for i in (1, 2, 3):
        w, b = params[f"w{i}"], params[f"b{i}"]
        h = jnp.maximum(
            jnp.dot(h.astype(jnp.bfloat16), w, preferred_element_type=jnp.float32) + b,
            0.0)
    return h  # f32


def _check(out, ref, name):
    assert jnp.allclose(out.astype(jnp.float32), ref.astype(jnp.float32),
                        atol=3e-2, rtol=3e-2), f"mismatch ({name})"


if __name__ == "__main__":
    key = jax.random.PRNGKey(0)
    kx, kp = jax.random.split(key)
    params = init_params(kp)

    # Case 1: small batch -> single 32-row tile, no batch padding.
    x1 = jax.random.normal(kx, (32, INPUT_SIZE), dtype=jnp.float32)
    o1 = jax.block_until_ready(dnn_mnist28_forward(x1, params))
    assert o1.shape == (32, HIDDEN[-1]), o1.shape
    assert o1.dtype == jnp.bfloat16, o1.dtype
    _check(o1, reference_forward(x1, params), "B=32")

    # Case 2: ragged tiny batch (B=4 -> padded to one 16-row tile, sliced back).
    x2 = x1[:4]
    o2 = jax.block_until_ready(dnn_mnist28_forward(x2, params))
    assert o2.shape == (4, HIDDEN[-1]), o2.shape
    _check(o2, reference_forward(x2, params), "B=4")

    # Case 3: force a multi-step grid (3 tiles of 16 rows) to exercise the
    # batch loop / resident-weight path at small scale.
    x3 = jax.random.normal(jax.random.PRNGKey(1), (48, INPUT_SIZE), dtype=jnp.float32)
    o3 = jax.block_until_ready(dnn_mnist28_forward(x3, params, tm_max=16))
    assert o3.shape == (48, HIDDEN[-1]), o3.shape
    _check(o3, reference_forward(x3, params), "B=48, tm_max=16")

    print("KERNEL_OK")
</pallas_src>

<mosaic_0001>
module attributes {stable_mosaic.version = 11 : i64} {
  func.func @_mlp_kernel(%arg0: i32, %arg1: memref<32x784xf32, #tpu.memory_space<vmem>>, %arg2: memref<784x128xbf16, #tpu.memory_space<vmem>>, %arg3: memref<1x128xf32, #tpu.memory_space<vmem>>, %arg4: memref<128x256xbf16, #tpu.memory_space<vmem>>, %arg5: memref<1x256xf32, #tpu.memory_space<vmem>>, %arg6: memref<256x128xbf16, #tpu.memory_space<vmem>>, %arg7: memref<1x128xf32, #tpu.memory_space<vmem>>, %arg8: memref<32x128xbf16, #tpu.memory_space<vmem>>) attributes {dimension_semantics = [#tpu.dimension_semantics<parallel>], iteration_bounds = array<i64: 1>, scalar_prefetch = 0 : i64, scratch_operands = 0 : i64, tpu.core_type = #tpu.core_type<tc>, window_params = [{transform_indices = @transform_0, window_bounds = array<i64: 32, 784>}, {pipeline_mode = #tpu.pipeline_mode<synchronous>, transform_indices = @transform_1, window_bounds = array<i64: 784, 128>}, {pipeline_mode = #tpu.pipeline_mode<synchronous>, transform_indices = @transform_2, window_bounds = array<i64: 1, 128>}, {pipeline_mode = #tpu.pipeline_mode<synchronous>, transform_indices = @transform_3, window_bounds = array<i64: 128, 256>}, {pipeline_mode = #tpu.pipeline_mode<synchronous>, transform_indices = @transform_4, window_bounds = array<i64: 1, 256>}, {pipeline_mode = #tpu.pipeline_mode<synchronous>, transform_indices = @transform_5, window_bounds = array<i64: 256, 128>}, {pipeline_mode = #tpu.pipeline_mode<synchronous>, transform_indices = @transform_6, window_bounds = array<i64: 1, 128>}, {transform_indices = @transform_7, window_bounds = array<i64: 32, 128>}]} {
    %c0 = arith.constant 0 : index
    %c0_0 = arith.constant 0 : index
    %0 = vector.load %arg1[%c0, %c0_0] : memref<32x784xf32, #tpu.memory_space<vmem>>, vector<32x784xf32>
    %1 = arith.truncf %0 : vector<32x784xf32> to vector<32x784xbf16>
    %c0_1 = arith.constant 0 : index
    %c0_2 = arith.constant 0 : index
    %2 = vector.load %arg2[%c0_1, %c0_2] : memref<784x128xbf16, #tpu.memory_space<vmem>>, vector<784x128xbf16>
    %cst = arith.constant dense<0.000000e+00> : vector<32x128xf32>
    %3 = tpu.matmul %1, %2, %cst {dimension_numbers = #tpu.dot_dimension_numbers<[1], [0], [0], [1], [0, 0, 1, 1], [], []>} : vector<32x784xbf16>, vector<784x128xbf16>, vector<32x128xf32> -> vector<32x128xf32>
    %c0_3 = arith.constant 0 : index
    %c0_4 = arith.constant 0 : index
    %4 = vector.load %arg3[%c0_3, %c0_4] : memref<1x128xf32, #tpu.memory_space<vmem>>, vector<1x128xf32>
    %5 = vector.broadcast %4 : vector<1x128xf32> to vector<32x128xf32>
    %6 = arith.addf %3, %5 : vector<32x128xf32>
    %cst_5 = arith.constant 0.000000e+00 : f32
    %7 = vector.broadcast %cst_5 : f32 to vector<32x128xf32>
    %8 = arith.maximumf %6, %7 : vector<32x128xf32>
    %9 = arith.truncf %8 : vector<32x128xf32> to vector<32x128xbf16>
    %c0_6 = arith.constant 0 : index
    %c0_7 = arith.constant 0 : index
    %10 = vector.load %arg4[%c0_6, %c0_7] : memref<128x256xbf16, #tpu.memory_space<vmem>>, vector<128x256xbf16>
    %cst_8 = arith.constant dense<0.000000e+00> : vector<32x256xf32>
    %11 = tpu.matmul %9, %10, %cst_8 {dimension_numbers = #tpu.dot_dimension_numbers<[1], [0], [0], [1], [0, 0, 1, 1], [], []>} : vector<32x128xbf16>, vector<128x256xbf16>, vector<32x256xf32> -> vector<32x256xf32>
    %c0_9 = arith.constant 0 : index
    %c0_10 = arith.constant 0 : index
    %12 = vector.load %arg5[%c0_9, %c0_10] : memref<1x256xf32, #tpu.memory_space<vmem>>, vector<1x256xf32>
    %13 = vector.broadcast %12 : vector<1x256xf32> to vector<32x256xf32>
    %14 = arith.addf %11, %13 : vector<32x256xf32>
    %cst_11 = arith.constant 0.000000e+00 : f32
    %15 = vector.broadcast %cst_11 : f32 to vector<32x256xf32>
    %16 = arith.maximumf %14, %15 : vector<32x256xf32>
    %17 = arith.truncf %16 : vector<32x256xf32> to vector<32x256xbf16>
    %c0_12 = arith.constant 0 : index
    %c0_13 = arith.constant 0 : index
    %18 = vector.load %arg6[%c0_12, %c0_13] : memref<256x128xbf16, #tpu.memory_space<vmem>>, vector<256x128xbf16>
    %cst_14 = arith.constant dense<0.000000e+00> : vector<32x128xf32>
    %19 = tpu.matmul %17, %18, %cst_14 {dimension_numbers = #tpu.dot_dimension_numbers<[1], [0], [0], [1], [0, 0, 1, 1], [], []>} : vector<32x256xbf16>, vector<256x128xbf16>, vector<32x128xf32> -> vector<32x128xf32>
    %c0_15 = arith.constant 0 : index
    %c0_16 = arith.constant 0 : index
    %20 = vector.load %arg7[%c0_15, %c0_16] : memref<1x128xf32, #tpu.memory_space<vmem>>, vector<1x128xf32>
    %21 = vector.broadcast %20 : vector<1x128xf32> to vector<32x128xf32>
    %22 = arith.addf %19, %21 : vector<32x128xf32>
    %cst_17 = arith.constant 0.000000e+00 : f32
    %23 = vector.broadcast %cst_17 : f32 to vector<32x128xf32>
    %24 = arith.maximumf %22, %23 : vector<32x128xf32>
    %25 = arith.truncf %24 : vector<32x128xf32> to vector<32x128xbf16>
    %c0_18 = arith.constant 0 : index
    %c0_19 = arith.constant 0 : index
    %26 = vector.load %arg8[%c0_18, %c0_19] : memref<32x128xbf16, #tpu.memory_space<vmem>>, vector<32x128xbf16>
    tpu.vector_store %arg8[%c0_18, %c0_19], %25 {strides = array<i32>} : memref<32x128xbf16, #tpu.memory_space<vmem>>, vector<32x128xbf16>,
    return
  }
  func.func @transform_0(%arg0: i32) -> (i32, i32) {
    %c0_i32 = arith.constant 0 : i32
    %c0_i32_0 = arith.constant 0 : i32
    return %arg0, %c0_i32 : i32, i32
  }
  func.func @transform_1(%arg0: i32) -> (i32, i32) {
    %c0_i32 = arith.constant 0 : i32
    %c0_i32_0 = arith.constant 0 : i32
    %c0_i32_1 = arith.constant 0 : i32
    return %c0_i32, %c0_i32_0 : i32, i32
  }
  func.func @transform_2(%arg0: i32) -> (i32, i32) {
    %c0_i32 = arith.constant 0 : i32
    %c0_i32_0 = arith.constant 0 : i32
    %c0_i32_1 = arith.constant 0 : i32
    return %c0_i32, %c0_i32_0 : i32, i32
  }
  func.func @transform_3(%arg0: i32) -> (i32, i32) {
    %c0_i32 = arith.constant 0 : i32
    %c0_i32_0 = arith.constant 0 : i32
    %c0_i32_1 = arith.constant 0 : i32
    return %c0_i32, %c0_i32_0 : i32, i32
  }
  func.func @transform_4(%arg0: i32) -> (i32, i32) {
    %c0_i32 = arith.constant 0 : i32
    %c0_i32_0 = arith.constant 0 : i32
    %c0_i32_1 = arith.constant 0 : i32
    return %c0_i32, %c0_i32_0 : i32, i32
  }
  func.func @transform_5(%arg0: i32) -> (i32, i32) {
    %c0_i32 = arith.constant 0 : i32
    %c0_i32_0 = arith.constant 0 : i32
    %c0_i32_1 = arith.constant 0 : i32
    return %c0_i32, %c0_i32_0 : i32, i32
  }
  func.func @transform_6(%arg0: i32) -> (i32, i32) {
    %c0_i32 = arith.constant 0 : i32
    %c0_i32_0 = arith.constant 0 : i32
    %c0_i32_1 = arith.constant 0 : i32
    return %c0_i32, %c0_i32_0 : i32, i32
  }
  func.func @transform_7(%arg0: i32) -> (i32, i32) {
    %c0_i32 = arith.constant 0 : i32
    %c0_i32_0 = arith.constant 0 : i32
    return %arg0, %c0_i32 : i32, i32
  }
}

</mosaic_0001>

<bundles_post_ra>
// kernel: tpu_custom_call.1
= control target key start
LH: loop header
LB: loop body
LE: loop exit
PB: predicated region body
PF: predicated region fallthrough
CT: control target
= control target key end

     0   :  { %12 = vsyncpa [#allocation3], 0  ;;  %s1689_s0 = inlined_call_operand.hbm [shape: f32[32,784], index: 0, kind: input, shape index: {}]   ;;  %s1690_s1 = inlined_call_operand.hbm [shape: bf16[784,128], index: 1, kind: input, shape index: {}]   ;;  %s1691_s2 = inlined_call_operand.vmem [shape: f32[1,128], index: 2, kind: input, shape index: {}]   ;;  %s1692_s3 = inlined_call_operand.hbm [shape: bf16[128,256], index: 3, kind: input, shape index: {}]   ;;  %s1693_s4 = inlined_call_operand.vmem [shape: f32[1,256], index: 4, kind: input, shape index: {}]   ;;  %s1694_s5 = inlined_call_operand.hbm [shape: bf16[256,128], index: 5, kind: input, shape index: {}]   ;;  %s1695_s6 = inlined_call_operand.vmem [shape: f32[1,128], index: 6, kind: input, shape index: {}]   ;;  %s1696_s7 = inlined_call_operand.hbm [shape: bf16[32,128], index: 7, kind: output, shape index: {}]  }
   0x1   :  { %13 = vsyncpa [#allocation6], 0 }
   0x2   :  { %14 = vsyncpa [#allocation9], 0  ;;  %s33_s26 = sshll.u32 %s1690_s1, 4  ;;  %s34_s26 = int_to_ptr.hbm [resolvable:$true] %s33_s26 }
   0x3   :  { %15 = vsyncpa [#allocation4], 0  ;;  %s1597_s27 = smov [#allocation5]   ;;  %s20_s8 = sshll.u32 %s1689_s0, 4  ;;  %s21_s8 = int_to_ptr.hbm [resolvable:$true] %s20_s8 }
   0x4   :  { %s35_s28 = sshll.u32 %s1597_s27, 4  ;;  %s1598_s9 = smov 64   ;;  %s36_s28 = int_to_ptr.vmem [resolvable:$true] %s35_s28 }
   0x5   :  { %s1599_s10 = smov 4   ;;  %s1600_s11 = smov [#allocation2]  }
   0x6   :  { %41 = dma.hbm_to_vmem [thread:$0]  %s34_s26, 6272, %s36_s28, [#allocation6], %s1598_s9, %s1598_s9, %s1599_s10  }
   0x7   :  { %s22_s12 = sshll.u32 %s1600_s11, 4  ;;  %s1601_s1 = smov 896   ;;  %s23_s12 = int_to_ptr.vmem [resolvable:$true] %s22_s12 }
   0x8   :  { %s1602_s13 = smov 56   ;;  %s48_s16 = sshll.u32 %s1692_s3, 4  ;;  %s49_s16 = int_to_ptr.hbm [resolvable:$true] %s48_s16 }
   0x9   :  { %28 = dma.hbm_to_vmem [thread:$0]  %s21_s8, 3584, %s23_s12, [#allocation3], %s1601_s1, %s1601_s1, %s1602_s13  }
   0xa   :  { %s1603_s17 = smov [#allocation7]   ;;  %s63_s20 = sshll.u32 %s1694_s5, 4  ;;  %s64_s20 = int_to_ptr.hbm [resolvable:$true] %s63_s20 }
   0xb   :  { %s50_s0 = sshll.u32 %s1603_s17, 4  ;;  %s1604_s21 = smov 128   ;;  %s51_s0 = int_to_ptr.vmem [resolvable:$true] %s50_s0 }
   0xc   :  { %s1605_s22 = smov 8   ;;  %s1606_s23 = smov [#allocation8]  }
   0xd   :  { %56 = dma.hbm_to_vmem [thread:$0]  %s49_s16, 2048, %s51_s0, [#allocation6], %s1604_s21, %s1604_s21, %s1605_s22  }
   0xe   :  { %s65_s24 = sshll.u32 %s1606_s23, 4  ;;  %s66_s24 = int_to_ptr.vmem [resolvable:$true] %s65_s24 }
   0xf   :  { %71 = dma.hbm_to_vmem [thread:$0]  %s64_s20, 2048, %s66_s24, [#allocation9], %s1598_s9, %s1598_s9, %s1599_s10  }
  0x10   :  { %1589 = dma.done.wait [#allocation3], 3584  }
  0x11   :  { %1590 = vsyncadd [#allocation3], 4294963712 }
  0x12   :  { %1591 = dma.done.wait [#allocation6], 8320  }
  0x13   :  { %1592 = vsyncadd [#allocation6], 4294958976 }
  0x14   :  { %1593 = dma.done.wait [#allocation9], 2048  }
  0x15   :  { %1594 = vsyncadd [#allocation9], 4294965248  ;;  %v1363_v0 = vld [vmem:[#allocation5 + $0x38] sm:$0xff]  ;;  %v1362_v4 = vld [vmem:[#allocation5 + $0x30] sm:$0xff]  ;;  %vm529_vm0 = vcmask 130048   ;;  %s1607_s27 = smov [#allocation10]  }
  0x16   :  { %v1371_v1 = vld [vmem:[#allocation5 + $0x78] sm:$0xff]  ;;  %536 = vmatpush.bf16.msra.mxu0 %v1363_v0  ;;  %v1370_v5 = vld [vmem:[#allocation5 + $0x70] sm:$0xff]  ;;  %v1361_v8 = vld [vmem:[#allocation5 + $0x28] sm:$0xff]  ;;  %s1015_s30 = sshll.u32 %s1696_s7, 4  ;;  %s1016_s30 = int_to_ptr.hbm [resolvable:$true] %s1015_s30 }
  0x17   :  { %v1379_v2 = vld [vmem:[#allocation5 + $0xb8] sm:$0xff]  ;;  %555 = vmatpush.bf16.msra.mxu1 %v1371_v1  ;;  %v1378_v6 = vld [vmem:[#allocation5 + $0xb0] sm:$0xff]  ;;  %v1369_v9 = vld [vmem:[#allocation5 + $0x68] sm:$0xff] }
  0x18   :  { %v1387_v3 = vld [vmem:[#allocation5 + $0xf8] sm:$0xff]  ;;  %574 = vmatpush.bf16.msra.mxu2 %v1379_v2  ;;  %v1386_v7 = vld [vmem:[#allocation5 + $0xf0] sm:$0xff]  ;;  %v1377_v10 = vld [vmem:[#allocation5 + $0xa8] sm:$0xff] }
  0x19   :  { %593 = vmatpush.bf16.msra.mxu3 %v1387_v3  ;;  %v1385_v11 = vld [vmem:[#allocation5 + $0xe8] sm:$0xff]  ;;  %v1360_v12 = vld [vmem:[#allocation5 + $0x20] sm:$0xff]  ;;  %v1359_v16 = vld [vmem:[#allocation5 + $0x18] sm:$0xff] }
  0x1a   :  { %537 = vmatpush.bf16.msra.mxu0 %v1362_v4  ;;  %v1368_v13 = vld [vmem:[#allocation5 + $0x60] sm:$0xff]  ;;  %v1367_v17 = vld [vmem:[#allocation5 + $0x58] sm:$0xff]  ;;  %v1358_v20 = vld [vmem:[#allocation5 + $0x10] sm:$0xff] }
  0x1b   :  { %556 = vmatpush.bf16.msra.mxu1 %v1370_v5  ;;  %v1376_v14 = vld [vmem:[#allocation5 + $0xa0] sm:$0xff]  ;;  %v1375_v18 = vld [vmem:[#allocation5 + $0x98] sm:$0xff]  ;;  %v1366_v21 = vld [vmem:[#allocation5 + $0x50] sm:$0xff] }
  0x1c   :  { %575 = vmatpush.bf16.msra.mxu2 %v1378_v6  ;;  %v1384_v15 = vld [vmem:[#allocation5 + $0xe0] sm:$0xff]  ;;  %v1383_v19 = vld [vmem:[#allocation5 + $0xd8] sm:$0xff]  ;;  %v1374_v22 = vld [vmem:[#allocation5 + $0x90] sm:$0xff] }
  0x1d   :  { %594 = vmatpush.bf16.msra.mxu3 %v1386_v7  ;;  %v1382_v23 = vld [vmem:[#allocation5 + $0xd0] sm:$0xff]  ;;  %v1357_v24 = vld [vmem:[#allocation5 + $0x8] sm:$0xff]  ;;  %v1356_v28 = vld [vmem:[#allocation5] sm:$0xff] }
  0x1e   :  { %538 = vmatpush.bf16.msra.mxu0 %v1361_v8  ;;  %v1365_v25 = vld [vmem:[#allocation5 + $0x48] sm:$0xff]  ;;  %v1364_v29 = vld [vmem:[#allocation5 + $0x40] sm:$0xff]  ;;  %v98_v33 = vld [vmem:[#allocation2 + $0x38] sm:$0xff] }
  0x1f   :  { %557 = vmatpush.bf16.msra.mxu1 %v1369_v9  ;;  %v1373_v26 = vld [vmem:[#allocation5 + $0x88] sm:$0xff]  ;;  %v1372_v30 = vld [vmem:[#allocation5 + $0x80] sm:$0xff]  ;;  %v93_v36 = vld [vmem:[#allocation2 + $0x10] sm:$0xff] }
  0x20   :  { %576 = vmatpush.bf16.msra.mxu2 %v1377_v10  ;;  %v1381_v27 = vld [vmem:[#allocation5 + $0xc8] sm:$0xff]  ;;  %v1380_v31 = vld [vmem:[#allocation5 + $0xc0] sm:$0xff]  ;;  %v1395_v39 = vld [vmem:[#allocation5 + $0x138] sm:$0xff] }
  0x21   :  { %595 = vmatpush.bf16.msra.mxu3 %v1385_v11  ;;  %v91_v32 = vld [vmem:[#allocation2] sm:$0xff]  ;;  %v92_v34 = vld [vmem:[#allocation2 + $0x8] sm:$0xff]  ;;  %v94_v40 = vld [vmem:[#allocation2 + $0x18] sm:$0xff] }
  0x22   :  { %539 = vmatpush.bf16.msra.mxu0 %v1360_v12  ;;  %v99_v35 = vld [vmem:[#allocation2 + $0x40] sm:$0xff]  ;;  %v100_v37 = vld [vmem:[#allocation2 + $0x48] sm:$0xff]  ;;  %v101_v41 = vld [vmem:[#allocation2 + $0x50] sm:$0xff]  ;;  %v119_v42 = vpack.c.bf16 %v98_v33, %v91_v32 }
  0x23   :  { %558 = vmatpush.bf16.msra.mxu1 %v1368_v13  ;;  %v1404_v38 = vld [vmem:[#allocation5 + $0x180] sm:$0xff]  ;;  %v120_v43 = vpack.c.bf16 %v99_v35, %v92_v34  ;;  %v121_v44 = vpack.c.bf16 %v100_v37, %v93_v36  ;;  %v1403_v45 = vld [vmem:[#allocation5 + $0x178] sm:$0xff]  ;;  %v122_v46 = vpack.c.bf16 %v101_v41, %v94_v40  ;;  %v1394_v47 = vld [vmem:[#allocation5 + $0x130] sm:$0xff] }
  0x24   :  { %577 = vmatpush.bf16.msra.mxu2 %v1376_v14  ;;  %v1402_v48 = vld [vmem:[#allocation5 + $0x170] sm:$0xff]  ;;  %v1393_v49 = vld [vmem:[#allocation5 + $0x128] sm:$0xff]  ;;  %v1392_v51 = vld [vmem:[#allocation5 + $0x120] sm:$0xff] }
  0x25   :  { %596 = vmatpush.bf16.msra.mxu3 %v1384_v15  ;;  %v1401_v50 = vld [vmem:[#allocation5 + $0x168] sm:$0xff]  ;;  %v1400_v52 = vld [vmem:[#allocation5 + $0x160] sm:$0xff]  ;;  %v105_v53 = vld [vmem:[#allocation2 + $0x70] sm:$0xff] }
  0x26   :  { %540 = vmatpush.bf16.msra.mxu0 %v1359_v16  ;;  %v112_v54 = vld [vmem:[#allocation2 + $0xa8] sm:$0xff]  ;;  %v106_v55 = vld [vmem:[#allocation2 + $0x78] sm:$0xff]  ;;  %v113_v56 = vld [vmem:[#allocation2 + $0xb0] sm:$0xff] }
  0x27   :  { %559 = vmatpush.bf16.msra.mxu1 %v1367_v17  ;;  %v107_v57 = vld [vmem:[#allocation2 + $0x80] sm:$0xff]  ;;  %v114_v58 = vld [vmem:[#allocation2 + $0xb8] sm:$0xff]  ;;  %v108_v60 = vld [vmem:[#allocation2 + $0x88] sm:$0xff]  ;;  %v126_v62 = vpack.c.bf16 %v112_v54, %v105_v53  ;;  %v127_v63 = vpack.c.bf16 %v113_v56, %v106_v55 }
  0x28   :  { %578 = vmatpush.bf16.msra.mxu2 %v1375_v18  ;;  %v1391_v59 = vld [vmem:[#allocation5 + $0x118] sm:$0xff]  ;;  %v115_v61 = vld [vmem:[#allocation2 + $0xc0] sm:$0xff]  ;;  %v128_v0 = vpack.c.bf16 %v114_v58, %v107_v57  ;;  %v1390_v3 = vld [vmem:[#allocation5 + $0x110] sm:$0xff] }
  0x29   :  { %597 = vmatpush.bf16.msra.mxu3 %v1383_v19  ;;  %v1399_v1 = vld [vmem:[#allocation5 + $0x158] sm:$0xff]  ;;  %v129_v2 = vpack.c.bf16 %v115_v61, %v108_v60  ;;  %v1398_v4 = vld [vmem:[#allocation5 + $0x150] sm:$0xff]  ;;  %v1389_v5 = vld [vmem:[#allocation5 + $0x108] sm:$0xff] }
  0x2a   :  { %541 = vmatpush.bf16.msra.mxu0 %v1358_v20  ;;  %v1397_v6 = vld [vmem:[#allocation5 + $0x148] sm:$0xff]  ;;  %v1388_v7 = vld [vmem:[#allocation5 + $0x100] sm:$0xff]  ;;  %v102_v10 = vld [vmem:[#allocation2 + $0x58] sm:$0xff] }
  0x2b   :  { %560 = vmatpush.bf16.msra.mxu1 %v1366_v21  ;;  %v1396_v8 = vld [vmem:[#allocation5 + $0x140] sm:$0xff]  ;;  %v96_v11 = vld [vmem:[#allocation2 + $0x28] sm:$0xff]  ;;  %v97_v13 = vld [vmem:[#allocation2 + $0x30] sm:$0xff] }
  0x2c   :  { %579 = vmatpush.bf16.msra.mxu2 %v1374_v22  ;;  %v95_v9 = vld [vmem:[#allocation2 + $0x20] sm:$0xff]  ;;  %v104_v14 = vld [vmem:[#allocation2 + $0x68] sm:$0xff]  ;;  %v109_v18 = vld [vmem:[#allocation2 + $0x90] sm:$0xff] }
  0x2d   :  { %598 = vmatpush.bf16.msra.mxu3 %v1382_v23  ;;  %v103_v12 = vld [vmem:[#allocation2 + $0x60] sm:$0xff]  ;;  %v123_v15 = vpack.c.bf16 %v102_v10, %v95_v9  ;;  %v125_v17 = vpack.c.bf16 %v104_v14, %v97_v13  ;;  %v116_v19 = vld [vmem:[#allocation2 + $0xc8] sm:$0xff]  ;;  %v110_v20 = vld [vmem:[#allocation2 + $0x98] sm:$0xff] }
  0x2e   :  { %542 = vmatpush.bf16.msra.mxu0 %v1357_v24  ;;  %v124_v16 = vpack.c.bf16 %v103_v12, %v96_v11  ;;  %v117_v21 = vld [vmem:[#allocation2 + $0xd0] sm:$0xff]  ;;  %v111_v22 = vld [vmem:[#allocation2 + $0xa0] sm:$0xff]  ;;  %v118_v23 = vld [vmem:[#allocation2 + $0xd8] sm:$0xff]  ;;  %v130_v24 = vpack.c.bf16 %v116_v19, %v109_v18 }
  0x2f   :  { %561 = vmatpush.bf16.msra.mxu1 %v1365_v25  ;;  %v131_v25 = vpack.c.bf16 %v117_v21, %v110_v20  ;;  %v1278_v33 = vld [vmem:[#allocation7 + $0x60] sm:$0xf]  ;;  %v1418_v34 = vld [vmem:[#allocation7 + $0x64] sm:$0xf0]  ;;  %v1417_v35 = vld [vmem:[#allocation7 + $0x64] sm:$0xf] }
  0x30   :  { %580 = vmatpush.bf16.msra.mxu2 %v1373_v26  ;;  %v132_v26 = vpack.c.bf16 %v118_v23, %v111_v22  ;;  %v1279_v36 = vor.u32 %v1418_v34, %v1278_v33  ;;  %v1280_v37 = vld [vmem:[#allocation7 + $0x68] sm:$0xf0]  ;;  %v1416_v40 = vld [vmem:[#allocation7 + $0x54] sm:$0xf0]  ;;  %v1254_v53 = vld [vmem:[#allocation7 + $0x30] sm:$0xf] }
  0x31   :  { %599 = vmatpush.bf16.msra.mxu3 %v1381_v27  ;;  %v1286_v27 = vld [vmem:[#allocation7 + $0x70] sm:$0xf]  ;;  %v1412_v54 = vld [vmem:[#allocation7 + $0x34] sm:$0xf0]  ;;  %v1411_v56 = vld [vmem:[#allocation7 + $0x34] sm:$0xf] }
  0x32   :  { %543 = vmatpush.bf16.msra.mxu0 %v1356_v28  ;;  %v1420_v28 = vld [vmem:[#allocation7 + $0x74] sm:$0xf0]  ;;  %v1255_v55 = vor.u32 %v1412_v54, %v1254_v53  ;;  %v1256_v57 = vld [vmem:[#allocation7 + $0x38] sm:$0xf0]  ;;  %v1230_v13 = vld [vmem:[#allocation7] sm:$0xf] }
  0x33   :  { %562 = vmatpush.bf16.msra.mxu1 %v1364_v29  ;;  %v1287_v29 = vor.u32 %v1420_v28, %v1286_v27  ;;  %v1259_v58 = vor.u32 %v1411_v56, %v1256_v57  ;;  %v1406_v14 = vld [vmem:[#allocation7 + $0x4] sm:$0xf0]  ;;  %v1467_v19 = vld [vmem:[%s1691_s2] ss:$0 sm:$0xff] }
  0x34   :  { %581 = vmatpush.bf16.msra.mxu2 %v1372_v30  ;;  %v1419_v30 = vld [vmem:[#allocation7 + $0x74] sm:$0xf] }
  0x35   :  { %600 = vmatpush.bf16.msra.mxu3 %v1380_v31  ;;  %544 = vmatmul.bf16.vlgmr.msra.gmra.mxu0 %v119_v42  ;;  %v1288_v31 = vld [vmem:[#allocation7 + $0x78] sm:$0xf0]  ;;  %v1415_v42 = vld [vmem:[#allocation7 + $0x54] sm:$0xf] }
  0x36   :  { %612 = vmatpush.bf16.msrb.mxu0 %v1395_v39  ;;  %563 = vmatmul.bf16.vlgmr.msra.gmra.mxu1 %v120_v43  ;;  %v1666_v32 = vor.u32 %v1419_v30, %v1288_v31  ;;  %v1270_v39 = vld [vmem:[#allocation7 + $0x50] sm:$0xf]  ;;  %v1272_v43 = vld [vmem:[#allocation7 + $0x58] sm:$0xf0] }
  0x37   :  { %582 = vmatmul.bf16.vlgmr.msra.gmra.mxu2 %v121_v44  ;;  %631 = vmatpush.bf16.msrb.mxu1 %v1403_v45  ;;  %v1271_v41 = vor.u32 %v1416_v40, %v1270_v39  ;;  %v1275_v44 = vor.u32 %v1415_v42, %v1272_v43 }
  0x38   :  { %657 = vmatpush.bf16.msrb.mxu2 %v1404_v38  ;;  %601 = vmatmul.bf16.vlgmr.msra.gmra.mxu3 %v122_v46  ;;  %v1669_v38 = vor.u32 %v1417_v35, %v1280_v37 }
  0x39   :  { %777 = vmatpush.bf16.msrb.mxu3 %v1287_v29 }
  0x3a   :  { %613 = vmatpush.bf16.msrb.mxu0 %v1394_v47  ;;  %v1262_v47 = vld [vmem:[#allocation7 + $0x40] sm:$0xf] }
  0x3b   :  { %632 = vmatpush.bf16.msrb.mxu1 %v1402_v48  ;;  %v1414_v48 = vld [vmem:[#allocation7 + $0x44] sm:$0xf0] }
  0x3d   :  { %778 = vmatpush.bf16.msrb.mxu3 %v1279_v36 }
  0x3e   :  { %614 = vmatpush.bf16.msrb.mxu0 %v1393_v49  ;;  %v1413_v49 = vld [vmem:[#allocation7 + $0x44] sm:$0xf] }
  0x3f   :  { %633 = vmatpush.bf16.msrb.mxu1 %v1401_v50  ;;  %v1263_v50 = vor.u32 %v1414_v48, %v1262_v47 }
  0x41   :  { %779 = vmatpush.bf16.msrb.mxu3 %v1271_v41 }
  0x42   :  { %615 = vmatpush.bf16.msrb.mxu0 %v1392_v51  ;;  %v1264_v51 = vld [vmem:[#allocation7 + $0x48] sm:$0xf0] }
  0x43   :  { %634 = vmatpush.bf16.msrb.mxu1 %v1400_v52  ;;  %v1267_v52 = vor.u32 %v1413_v49, %v1264_v51 }
  0x45   :  { %549 = vmatmul.bf16.gmra.mxu0 %v126_v62  ;;  %780 = vmatpush.bf16.msrb.mxu3 %v1263_v50  ;;  %v1246_v62 = vld [vmem:[#allocation7 + $0x20] sm:$0xf] }
  0x46   :  { %616 = vmatpush.bf16.msrb.mxu0 %v1391_v59  ;;  %568 = vmatmul.bf16.gmra.mxu1 %v127_v63  ;;  %v1410_v63 = vld [vmem:[#allocation7 + $0x24] sm:$0xf0] }
  0x47   :  { %587 = vmatmul.bf16.gmra.mxu2 %v128_v0  ;;  %635 = vmatpush.bf16.msrb.mxu1 %v1399_v1  ;;  %v1409_v0 = vld [vmem:[#allocation7 + $0x24] sm:$0xf]  ;;  %v1247_v1 = vor.u32 %v1410_v63, %v1246_v62 }
  0x48   :  { %606 = vmatmul.bf16.gmra.mxu3 %v129_v2  ;;  %v1248_v2 = vld [vmem:[#allocation7 + $0x28] sm:$0xf0] }
  0x49   :  { %781 = vmatpush.bf16.msrb.mxu3 %v1255_v55 }
  0x4a   :  { %617 = vmatpush.bf16.msrb.mxu0 %v1390_v3  ;;  %v1251_v3 = vor.u32 %v1409_v0, %v1248_v2  ;;  %v1435_v2 = vld [vmem:[#allocation8 + $0x70] sm:$0xff] }
  0x4b   :  { %636 = vmatpush.bf16.msrb.mxu1 %v1398_v4  ;;  %v1238_v4 = vld [vmem:[#allocation7 + $0x10] sm:$0xf] }
  0x4d   :  { %782 = vmatpush.bf16.msrb.mxu3 %v1247_v1 }
  0x4e   :  { %618 = vmatpush.bf16.msrb.mxu0 %v1389_v5  ;;  %v1408_v5 = vld [vmem:[#allocation7 + $0x14] sm:$0xf0] }
  0x4f   :  { %637 = vmatpush.bf16.msrb.mxu1 %v1397_v6  ;;  %v1239_v6 = vor.u32 %v1408_v5, %v1238_v4 }
  0x51   :  { %783 = vmatpush.bf16.msrb.mxu3 %v1239_v6  ;;  %v1434_v6 = vld [vmem:[#allocation8 + $0x68] sm:$0xff] }
  0x52   :  { %619 = vmatpush.bf16.msrb.mxu0 %v1388_v7  ;;  %v1407_v7 = vld [vmem:[#allocation7 + $0x14] sm:$0xf] }
  0x53   :  { %638 = vmatpush.bf16.msrb.mxu1 %v1396_v8  ;;  %v1240_v8 = vld [vmem:[#allocation7 + $0x18] sm:$0xf0] }
  0x54   :  { %v1243_v9 = vor.u32 %v1407_v7, %v1240_v8  ;;  %v1426_v7 = vld [vmem:[#allocation8 + $0x28] sm:$0xff] }
  0x55   :  { %620 = vmatmul.bf16.vlgmr.msrb.gmra.mxu0 %v123_v15  ;;  %v1405_v15 = vld [vmem:[#allocation7 + $0x4] sm:$0xf] }
  0x56   :  { %639 = vmatmul.bf16.vlgmr.msrb.gmra.mxu1 %v124_v16  ;;  %796 = vmatpush.bf16.msra.mxu0 %v1666_v32  ;;  %v1231_v16 = vor.u32 %v1406_v14, %v1230_v13  ;;  %v1433_v13 = vld [vmem:[#allocation8 + $0x60] sm:$0xff] }
  0x57   :  { %1226 = vmatmul.msk.bf16.vlgmr.msrb.gmra.mxu2 %vm529_vm0, %v125_v17  ;;  %v1232_v17 = vld [vmem:[#allocation7 + $0x8] sm:$0xf0] }
  0x58   :  { %v1235_v18 = vor.u32 %v1405_v15, %v1232_v17  ;;  %784 = vmatpush.bf16.msrb.mxu3 %v1231_v16  ;;  %v1432_v17 = vld [vmem:[#allocation8 + $0x58] sm:$0xff] }
  0x5a   :  { %797 = vmatpush.bf16.msra.mxu0 %v1669_v38 }
  0x5c   :  { %1448 = vmatpush.bf16.msra.mxu3 %v1666_v32 }
  0x5e   :  { %798 = vmatpush.bf16.msra.mxu0 %v1275_v44 }
  0x60   :  { %1449 = vmatpush.bf16.msra.mxu3 %v1669_v38 }
  0x62   :  { %799 = vmatpush.bf16.msra.mxu0 %v1267_v52 }
  0x64   :  { %1450 = vmatpush.bf16.msra.mxu3 %v1275_v44 }
  0x65   :  { %625 = vmatmul.bf16.gmra.mxu0 %v130_v24 }
  0x66   :  { %644 = vmatmul.bf16.gmra.mxu1 %v131_v25  ;;  %800 = vmatpush.bf16.msra.mxu0 %v1259_v58 }
  0x67   :  { %1227 = vmatmul.msk.bf16.gmra.mxu2 %vm529_vm0, %v132_v26 }
  0x68   :  { %1451 = vmatpush.bf16.msra.mxu3 %v1267_v52 }
  0x6a   :  { %801 = vmatpush.bf16.msra.mxu0 %v1251_v3 }
  0x6c   :  { %1452 = vmatpush.bf16.msra.mxu3 %v1259_v58 }
  0x6e   :  { %802 = vmatpush.bf16.msra.mxu0 %v1243_v9 }
  0x70   :  { %1453 = vmatpush.bf16.msra.mxu3 %v1251_v3  ;;  %v1427_v3 = vld [vmem:[#allocation8 + $0x30] sm:$0xff] }
  0x72   :  { %803 = vmatpush.bf16.msra.mxu0 %v1235_v18 }
  0x74   :  { %1454 = vmatpush.bf16.msra.mxu3 %v1243_v9 }
  0x78   :  { %1455 = vmatpush.bf16.msra.mxu3 %v1235_v18  ;;  %v1425_v18 = vld [vmem:[#allocation8 + $0x20] sm:$0xff] }
  0xb2   :  { %v545_v45 = vpop.f32.mrf.mxu0 }
  0xb3   :  { %v564_v46 = vpop.f32.mrf.mxu1  ;;  %v546_v24 = vadd.f32 %v1467_v19, %v545_v45 }
  0xb5   :  { %v565_v25 = vadd.f32 %v564_v46, %v546_v24  ;;  %v1422_v24 = vld [vmem:[#allocation8 + $0x8] sm:$0xff] }
  0xba   :  { %v583_v59 = vpop.f32.mrf.mxu2  ;;  %v547_v60 = vpop.f32.mrf.mxu0 }
  0xbb   :  { %v566_v61 = vpop.f32.mrf.mxu1  ;;  %v602_v20 = vpop.f32.mrf.mxu3  ;;  %v548_v26 = vadd.f32 %v1467_v19, %v547_v60  ;;  %v584_v31 = vadd.f32 %v583_v59, %v565_v25  ;;  %v1436_v60 = vld [vmem:[#allocation8 + $0x78] sm:$0xff]  ;;  %v1421_v25 = vld [vmem:[#allocation8] sm:$0xff] }
  0xbc   :  { %978 = vmatpush.bf16.msra.mxu2 %v1436_v60 }
  0xbd   :  { %v567_v32 = vadd.f32 %v566_v61, %v548_v26  ;;  %v603_v34 = vadd.f32 %v602_v20, %v584_v31  ;;  %v1428_v61 = vld [vmem:[#allocation8 + $0x38] sm:$0xff] }
  0xbe   :  { %959 = vmatpush.bf16.msra.mxu1 %v1428_v61  ;;  %v1424_v20 = vld [vmem:[#allocation8 + $0x18] sm:$0xff] }
  0xbf   :  { %v691_v26 = vld [vmem:[%s1693_s4] sm:$0x3] }
  0xc0   :  { %979 = vmatpush.bf16.msra.mxu2 %v1435_v2 }
  0xc2   :  { %v585_v10 = vpop.f32.mrf.mxu2  ;;  %v550_v11 = vpop.f32.mrf.mxu0  ;;  %960 = vmatpush.bf16.msra.mxu1 %v1427_v3 }
  0xc3   :  { %v569_v12 = vpop.f32.mrf.mxu1  ;;  %v604_v30 = vpop.f32.mrf.mxu3  ;;  %v586_v33 = vadd.f32 %v585_v10, %v567_v32  ;;  %v551_v40 = vadd.f32 %v1467_v19, %v550_v11  ;;  %v693_v32 = vperm.slane %v691_v26, 0 }
  0xc4   :  { %980 = vmatpush.bf16.msra.mxu2 %v1434_v6 }
  0xc5   :  { %v605_v36 = vadd.f32 %v604_v30, %v586_v33  ;;  %v570_v44 = vadd.f32 %v569_v12, %v551_v40 }
  0xc6   :  { %961 = vmatpush.bf16.msra.mxu1 %v1426_v7 }
  0xc8   :  { %981 = vmatpush.bf16.msra.mxu2 %v1433_v13 }
  0xca   :  { %v588_v21 = vpop.f32.mrf.mxu2  ;;  %v552_v22 = vpop.f32.mrf.mxu0  ;;  %962 = vmatpush.bf16.msra.mxu1 %v1425_v18 }
  0xcb   :  { %v571_v23 = vpop.f32.mrf.mxu1  ;;  %v607_v42 = vpop.f32.mrf.mxu3  ;;  %v553_v45 = vadd.f32 %v1467_v19, %v552_v22  ;;  %v589_v51 = vadd.f32 %v588_v21, %v570_v44  ;;  %v1431_v19 = vld [vmem:[#allocation8 + $0x50] sm:$0xff]  ;;  %v1430_v21 = vld [vmem:[#allocation8 + $0x48] sm:$0xff] }
  0xcc   :  { %982 = vmatpush.bf16.msra.mxu2 %v1432_v17  ;;  %v1423_v22 = vld [vmem:[#allocation8 + $0x10] sm:$0xff] }
  0xcd   :  { %v572_v52 = vadd.f32 %v571_v23, %v553_v45  ;;  %v608_v59 = vadd.f32 %v607_v42, %v589_v51  ;;  %v1429_v23 = vld [vmem:[#allocation8 + $0x40] sm:$0xff] }
  0xce   :  { %963 = vmatpush.bf16.msra.mxu1 %v1424_v20 }
  0xd0   :  { %983 = vmatpush.bf16.msra.mxu2 %v1431_v19 }
  0xd2   :  { %v590_v27 = vpop.f32.mrf.mxu2  ;;  %v621_v28 = vpop.f32.mrf.mxu0  ;;  %964 = vmatpush.bf16.msra.mxu1 %v1423_v22 }
  0xd3   :  { %v640_v29 = vpop.f32.mrf.mxu1  ;;  %v622_v37 = vadd.f32 %v621_v28, %v603_v34  ;;  %v591_v56 = vadd.f32 %v590_v27, %v572_v52  ;;  %v609_v58 = vpop.f32.mrf.mxu3  ;;  %v694_v28 = vperm.slane %v691_v26, 1 }
  0xd4   :  { %984 = vmatpush.bf16.msra.mxu2 %v1430_v21 }
  0xd5   :  { %v641_v43 = vadd.f32 %v640_v29, %v622_v37  ;;  %v610_v63 = vadd.f32 %v609_v58, %v591_v56 }
  0xd6   :  { %965 = vmatpush.bf16.msra.mxu1 %v1422_v24 }
  0xd8   :  { %985 = vmatpush.bf16.msra.mxu2 %v1429_v23 }
  0xda   :  { %v659_v35 = vpop.f32.mrf.mxu2  ;;  %v623_v39 = vpop.f32.mrf.mxu0  ;;  %966 = vmatpush.bf16.msra.mxu1 %v1421_v25 }
  0xdb   :  { %v642_v38 = vpop.f32.mrf.mxu1  ;;  %v624_v41 = vadd.f32 %v623_v39, %v605_v36  ;;  %v660_v46 = vadd.f32 %v659_v35, %v641_v43 }
  0xdd   :  { %v643_v47 = vadd.f32 %v642_v38, %v624_v41  ;;  %v669_v53 = vmax.f32 %v660_v46, 0.0 }
  0xe2   :  { %v661_v48 = vpop.f32.mrf.mxu2  ;;  %v626_v50 = vpop.f32.mrf.mxu0 }
  0xe3   :  { %v662_v49 = vadd.f32 %v661_v48, %v643_v47  ;;  %v645_v55 = vpop.f32.mrf.mxu1  ;;  %v627_v0 = vadd.f32 %v626_v50, %v608_v59  ;;  %v1468_v59 = vld [vmem:[%s1695_s6] ss:$0 sm:$0xff]  ;;  %s1013_s6 = sshll.u32 %s1607_s27, 4  ;;  %s1014_s6 = int_to_ptr.vmem [resolvable:$true] %s1013_s6 }
  0xe5   :  { %v670_v54 = vmax.f32 %v662_v49, 0.0  ;;  %v646_v5 = vadd.f32 %v645_v55, %v627_v0 }
  0xe7   :  { %v673_v57 = vpack.c.bf16 %v670_v54, %v669_v53 }
  0xe9   :  { %785 = vmatmul.bf16.vlgmr.msrb.gmra.mxu3 %v673_v57  ;;  %804 = vmatmul.bf16.vlgmr.msra.gmra.mxu0 %v673_v57 }
  0xea   :  { %v664_v62 = vpop.f32.mrf.mxu2  ;;  %v628_v1 = vpop.f32.mrf.mxu0 }
  0xeb   :  { %v629_v4 = vadd.f32 %v628_v1, %v610_v63  ;;  %v647_v8 = vpop.f32.mrf.mxu1  ;;  %v665_v9 = vadd.f32 %v664_v62, %v646_v5 }
  0xed   :  { %v648_v10 = vadd.f32 %v647_v8, %v629_v4  ;;  %v671_v14 = vmax.f32 %v665_v9, 0.0 }
  0xf2   :  { %v666_v11 = vpop.f32.mrf.mxu2 }
  0xf3   :  { %v667_v12 = vadd.f32 %v666_v11, %v648_v10 }
  0xf5   :  { %v672_v15 = vmax.f32 %v667_v12, 0.0 }
  0xf7   :  { %v674_v16 = vpack.c.bf16 %v672_v15, %v671_v14 }
  0xf9   :  { %790 = vmatmul.bf16.gmra.mxu3 %v674_v16 }
 0x109   :  { %809 = vmatmul.bf16.vlgmr.msra.gmra.mxu3 %v674_v16 }
 0x166   :  { %v805_v27 = vpop.f32.mrf.mxu0 }
 0x167   :  { %v806_v30 = vadd.f32 %v805_v27, %v694_v28 }
 0x169   :  { %v816_v34 = vmax.f32 %v806_v30, 0.0 }
 0x16c   :  { %v786_v29 = vpop.f32.mrf.mxu3 }
 0x16d   :  { %v787_v36 = vadd.f32 %v786_v29, %v693_v32 }
 0x16e   :  { %v807_v31 = vpop.f32.mrf.mxu0 }
 0x16f   :  { %v808_v33 = vadd.f32 %v807_v31, %v694_v28  ;;  %v815_v40 = vmax.f32 %v787_v36, 0.0 }
 0x171   :  { %v818_v35 = vmax.f32 %v808_v33, 0.0 }
 0x173   :  { %v824_v37 = vpack.c.bf16 %v818_v35, %v816_v34 }
 0x174   :  { %v788_v39 = vpop.f32.mrf.mxu3 }
 0x175   :  { %v789_v38 = vadd.f32 %v788_v39, %v693_v32  ;;  %986 = vmatmul.bf16.vlgmr.msra.gmra.mxu2 %v824_v37 }
 0x177   :  { %v817_v41 = vmax.f32 %v789_v38, 0.0 }
 0x179   :  { %v823_v42 = vpack.c.bf16 %v817_v41, %v815_v40 }
 0x17b   :  { %967 = vmatmul.bf16.vlgmr.msra.gmra.mxu1 %v823_v42 }
 0x17c   :  { %v791_v43 = vpop.f32.mrf.mxu3 }
 0x17d   :  { %v792_v44 = vadd.f32 %v791_v43, %v693_v32 }
 0x17f   :  { %v819_v47 = vmax.f32 %v792_v44, 0.0 }
 0x184   :  { %v793_v45 = vpop.f32.mrf.mxu3 }
 0x185   :  { %v794_v46 = vadd.f32 %v793_v45, %v693_v32 }
 0x187   :  { %v821_v48 = vmax.f32 %v794_v46, 0.0 }
 0x189   :  { %v825_v49 = vpack.c.bf16 %v821_v48, %v819_v47 }
 0x18b   :  { %972 = vmatmul.bf16.gmra.mxu1 %v825_v49 }
 0x18c   :  { %v810_v50 = vpop.f32.mrf.mxu3 }
 0x18d   :  { %v811_v51 = vadd.f32 %v810_v50, %v694_v28 }
 0x18f   :  { %v820_v54 = vmax.f32 %v811_v51, 0.0 }
 0x194   :  { %v812_v52 = vpop.f32.mrf.mxu3 }
 0x195   :  { %v813_v53 = vadd.f32 %v812_v52, %v694_v28 }
 0x197   :  { %v822_v55 = vmax.f32 %v813_v53, 0.0 }
 0x199   :  { %v826_v56 = vpack.c.bf16 %v822_v55, %v820_v54 }
 0x19b   :  { %991 = vmatmul.bf16.gmra.mxu2 %v826_v56 }
 0x1f8   :  { %v968_v57 = vpop.f32.mrf.mxu1  ;;  %v987_v58 = vpop.f32.mrf.mxu2 }
 0x1f9   :  { %v969_v60 = vadd.f32 %v1468_v59, %v968_v57 }
 0x1fb   :  { %v988_v62 = vadd.f32 %v987_v58, %v969_v60 }
 0x1fd   :  { %v997_v2 = vmax.f32 %v988_v62, 0.0 }
 0x200   :  { %v970_v61 = vpop.f32.mrf.mxu1  ;;  %v989_v0 = vpop.f32.mrf.mxu2 }
 0x201   :  { %v971_v63 = vadd.f32 %v1468_v59, %v970_v61 }
 0x203   :  { %v990_v1 = vadd.f32 %v989_v0, %v971_v63 }
 0x205   :  { %v998_v3 = vmax.f32 %v990_v1, 0.0 }
 0x207   :  { %v1440_v4 = vpack.c.bf16 %v998_v3, %v997_v2 }
 0x208   :  { %v973_v5 = vpop.f32.mrf.mxu1 }
 0x209   :  { %1441 = vst [vmem:[#allocation10] sm:$0xff] %v1440_v4   ;;  %v974_v8 = vadd.f32 %v1468_v59, %v973_v5 }
 0x210   :  { %v975_v7 = vpop.f32.mrf.mxu1 }
 0x211   :  { %v976_v9 = vadd.f32 %v1468_v59, %v975_v7 }
 0x21e   :  { %v992_v6 = vpop.f32.mrf.mxu2 }
 0x21f   :  { %v993_v10 = vadd.f32 %v992_v6, %v974_v8 }
 0x221   :  { %v999_v13 = vmax.f32 %v993_v10, 0.0 }
 0x226   :  { %v994_v11 = vpop.f32.mrf.mxu2 }
 0x227   :  { %v995_v12 = vadd.f32 %v994_v11, %v976_v9 }
 0x229   :  { %v1000_v14 = vmax.f32 %v995_v12, 0.0 }
 0x22b   :  { %v1445_v15 = vpack.c.bf16 %v1000_v14, %v999_v13 }
 0x22d   :  { %1447 = vst [vmem:[#allocation10 + $0x8] sm:$0xff] %v1445_v15  }
 0x22e   :  { %1021 = dma.vmem_to_hbm [thread:$0]  %s1014_s6, 256, %s1016_s30, [#allocation4], %s1598_s9, %s1598_s9, %s1599_s10  }
 0x22f   :  { %1595 = dma.done.wait [#allocation4], 256  }
 0x230   :  { %1596 = vsyncadd [#allocation4], 4294967040 }
 0x231   :  { %1026 = vsyncpa [#allocation3], 1 }
 0x232   :  { %1027 = vsyncpa [#allocation6], 1 }
 0x233   :  { %1028 = vsyncpa [#allocation9], 1 }
 0x234   :  { %1029 = vsyncpa [#allocation4], 1 }

</bundles_post_ra>
